<compile_context>
chip_gen: v7x
topology: tpu7x:2x2x1
jax: 0.10.0
libtpu: 0.0.40
codegen_flags: <defaults>
</compile_context>

<pallas_src>
import functools

import jax
import jax.numpy as jnp
from jax.experimental import pallas as pl
from jax.experimental.pallas import tpu as pltpu


def _fact_reduce_kernel(x1_ref, x2_ref, w_ref, shift_ref, o_ref):
    # x1_ref, x2_ref: (1, C_in, tm)      stride-2 pixel columns (pre-ReLU)
    # w_ref:          (2, C_half, C_in)  conv1/conv2 weights, BN scale folded in
    # shift_ref:      (2, C_half, 1)     BN shift (beta - mean * scale)
    # o_ref:          (1, 2, C_half, tm)
    p1 = jnp.maximum(x1_ref[0], 0.0)                       # ReLU
    p2 = jnp.maximum(x2_ref[0], 0.0)
    acc1 = jnp.dot(w_ref[0], p1, preferred_element_type=jnp.float32)
    acc2 = jnp.dot(w_ref[1], p2, preferred_element_type=jnp.float32)
    o_ref[0, 0] = (acc1 + shift_ref[0]).astype(o_ref.dtype)
    o_ref[0, 1] = (acc2 + shift_ref[1]).astype(o_ref.dtype)


@functools.partial(jax.jit, static_argnames=("eps",))
def factorized_reduce(x, w1, w2, gamma, beta, running_mean, running_var,
                      eps=1e-5):
    """Forward of FactorizedReduce.  x: (N, C_in, H, W) NCHW.  Returns NCHW."""
    N, C_in, H, W = x.shape
    assert H % 2 == 0 and W % 2 == 0, "FactorizedReduce needs even H, W"
    C_half = w1.shape[0]
    C_out = 2 * C_half
    Ho, Wo = H // 2, W // 2
    Mo = Ho * Wo
    itemsize = jnp.dtype(x.dtype).itemsize

    # Two stride-2 pixel grids (contiguous reshapes of the slices; no transpose).
    x1 = x[:, :, ::2, ::2].reshape(N, C_in, Mo)      # pixels (2i,   2j)   -> conv1
    x2 = x[:, :, 1::2, 1::2].reshape(N, C_in, Mo)    # pixels (2i+1, 2j+1) -> conv2

    # Eval-mode BN folded into the conv weights (scale) + per-channel shift.
    scale = gamma * jax.lax.rsqrt(running_var + eps)           # (C_out,)
    shift = beta - running_mean * scale                        # (C_out,)
    w1m = w1.reshape(C_half, C_in) * scale[:C_half, None]
    w2m = w2.reshape(C_half, C_in) * scale[C_half:, None]
    w_stack = jnp.stack([w1m, w2m], axis=0).astype(x.dtype)    # (2, C_half, C_in)
    shift_stack = shift.reshape(2, C_half, 1).astype(jnp.float32)

    # Pixel-tile size from an explicit VMEM budget (double-buffered blocks).
    per_col_bytes = itemsize * (2 * C_in + C_out)              # x1 + x2 + out per column
    vmem_budget = 8 * 1024 * 1024
    tm_cap = (vmem_budget // (2 * per_col_bytes)) // 128 * 128
    tm_cap = max(128, min(2048, tm_cap))
    if Mo <= tm_cap:
        tm = Mo                                   # full-extent block: no padding needed
        if N == 1 and Mo >= 256:
            # v7x megacore: keep >= 2 grid steps so both TensorCores get work.
            tm = -(-((Mo + 1) // 2) // 128) * 128
    else:
        tm = tm_cap                               # multiple of 128; ragged tail clipped

    grid = (N, pl.cdiv(Mo, tm))

    # Double-buffered blocks + resident weights/shift (with generous margin).
    vmem_needed = (2 * (2 * C_in + C_out) * tm + C_out * C_in + C_out) * itemsize
    vmem_limit = int(min(32 * 1024 * 1024, max(2 * vmem_needed, 16 * 1024 * 1024)))

    cost = pl.CostEstimate(
        flops=2 * N * Mo * C_in * C_out,
        transcendentals=0,
        bytes_accessed=itemsize * (2 * N * C_in * Mo + N * C_out * Mo + C_out * C_in)
        + 4 * C_out,
    )

    out = pl.pallas_call(
        _fact_reduce_kernel,
        out_shape=jax.ShapeDtypeStruct((N, 2, C_half, Mo), x.dtype),
        grid_spec=pltpu.PrefetchScalarGridSpec(
            num_scalar_prefetch=0,
            grid=grid,
            in_specs=[
                pl.BlockSpec((1, C_in, tm), lambda n, i: (n, 0, i)),
                pl.BlockSpec((1, C_in, tm), lambda n, i: (n, 0, i)),
                pl.BlockSpec((2, C_half, C_in), lambda n, i: (0, 0, 0)),
                pl.BlockSpec((2, C_half, 1), lambda n, i: (0, 0, 0)),
            ],
            out_specs=pl.BlockSpec((1, 2, C_half, tm), lambda n, i: (n, 0, 0, i)),
        ),
        compiler_params=pltpu.CompilerParams(
            dimension_semantics=("parallel", "parallel"),
            vmem_limit_bytes=vmem_limit,
        ),
        cost_estimate=cost,
    )(x1, x2, w_stack, shift_stack)

    # (N, 2, C_half, Mo) -> (N, C_out, Ho, Wo): pure reshape, no transpose.
    return out.reshape(N, C_out, Ho, Wo)


if __name__ == "__main__":
    # Small shapes consistent with FactorizedReduce(C_in=4, C_out=8).
    N, C_in, C_out, H, W = 2, 4, 8, 16, 16
    C_half = C_out // 2
    eps = 1e-5

    key = jax.random.PRNGKey(0)
    kx, kw1, kw2, kg, kb, km, kv = jax.random.split(key, 7)

    x = jax.random.normal(kx, (N, C_in, H, W), dtype=jnp.float32)
    w1 = jax.random.normal(kw1, (C_half, C_in, 1, 1), dtype=jnp.float32) * 0.1
    w2 = jax.random.normal(kw2, (C_half, C_in, 1, 1), dtype=jnp.float32) * 0.1
    gamma = jax.random.normal(kg, (C_out,), dtype=jnp.float32) * 0.1 + 1.0
    beta = jax.random.normal(kb, (C_out,), dtype=jnp.float32) * 0.1
    running_mean = jax.random.normal(km, (C_out,), dtype=jnp.float32) * 0.1
    running_var = jnp.abs(jax.random.normal(kv, (C_out,), dtype=jnp.float32)) * 0.1 + 1.0

    y = factorized_reduce(x, w1, w2, gamma, beta, running_mean, running_var,
                          eps=eps)
    jax.block_until_ready(y)

    # Reference in plain JAX: ReLU -> two stride-2 1x1 convs -> concat -> eval BN.
    x_relu = jnp.maximum(x, 0.0)
    ref1 = jax.lax.conv_general_dilated(
        x_relu, w1, window_strides=(2, 2), padding="VALID",
        dimension_numbers=("NCHW", "OIHW", "NCHW"))
    ref2 = jax.lax.conv_general_dilated(
        x_relu[:, :, 1:, 1:], w2, window_strides=(2, 2), padding="VALID",
        dimension_numbers=("NCHW", "OIHW", "NCHW"))
    ref = jnp.concatenate([ref1, ref2], axis=1)
    ref = (ref - running_mean[None, :, None, None]) / jnp.sqrt(
        running_var[None, :, None, None] + eps)
    ref = ref * gamma[None, :, None, None] + beta[None, :, None, None]

    assert y.shape == (N, C_out, H // 2, W // 2), y.shape
    assert jnp.allclose(y, ref, atol=1e-4, rtol=1e-4), float(jnp.max(jnp.abs(y - ref)))
    print("KERNEL_OK")
</pallas_src>

<mosaic_0001>
module attributes {stable_mosaic.version = 11 : i64} {
  func.func @_fact_reduce_kernel(%arg0: i32, %arg1: i32, %arg2: memref<1x4x64xf32, #tpu.memory_space<vmem>>, %arg3: memref<1x4x64xf32, #tpu.memory_space<vmem>>, %arg4: memref<2x4x4xf32, #tpu.memory_space<vmem>>, %arg5: memref<2x4x1xf32, #tpu.memory_space<vmem>>, %arg6: memref<1x2x4x64xf32, #tpu.memory_space<vmem>>) attributes {dimension_semantics = [#tpu.dimension_semantics<parallel>, #tpu.dimension_semantics<parallel>], iteration_bounds = array<i64: 2, 1>, scalar_prefetch = 0 : i64, scratch_operands = 0 : i64, tpu.core_type = #tpu.core_type<tc>, window_params = [{transform_indices = @transform_0, window_bounds = array<i64: 1, 4, 64>}, {transform_indices = @transform_1, window_bounds = array<i64: 1, 4, 64>}, {pipeline_mode = #tpu.pipeline_mode<synchronous>, transform_indices = @transform_2, window_bounds = array<i64: 2, 4, 4>}, {pipeline_mode = #tpu.pipeline_mode<synchronous>, transform_indices = @transform_3, window_bounds = array<i64: 2, 4, 1>}, {transform_indices = @transform_4, window_bounds = array<i64: 1, 2, 4, 64>}]} {
    %c0 = arith.constant 0 : index
    %c0_0 = arith.constant 0 : index
    %c0_1 = arith.constant 0 : index
    %0 = vector.load %arg2[%c0, %c0_0, %c0_1] : memref<1x4x64xf32, #tpu.memory_space<vmem>>, vector<1x4x64xf32>
    %1 = vector.shape_cast %0 : vector<1x4x64xf32> to vector<4x64xf32>
    %cst = arith.constant 0.000000e+00 : f32
    %2 = vector.broadcast %cst : f32 to vector<4x64xf32>
    %3 = arith.maximumf %1, %2 : vector<4x64xf32>
    %c0_2 = arith.constant 0 : index
    %c0_3 = arith.constant 0 : index
    %c0_4 = arith.constant 0 : index
    %4 = vector.load %arg3[%c0_2, %c0_3, %c0_4] : memref<1x4x64xf32, #tpu.memory_space<vmem>>, vector<1x4x64xf32>
    %5 = vector.shape_cast %4 : vector<1x4x64xf32> to vector<4x64xf32>
    %cst_5 = arith.constant 0.000000e+00 : f32
    %6 = vector.broadcast %cst_5 : f32 to vector<4x64xf32>
    %7 = arith.maximumf %5, %6 : vector<4x64xf32>
    %c0_6 = arith.constant 0 : index
    %c0_7 = arith.constant 0 : index
    %c0_8 = arith.constant 0 : index
    %8 = vector.load %arg4[%c0_6, %c0_7, %c0_8] : memref<2x4x4xf32, #tpu.memory_space<vmem>>, vector<1x4x4xf32>
    %9 = vector.shape_cast %8 : vector<1x4x4xf32> to vector<4x4xf32>
    %cst_9 = arith.constant dense<0.000000e+00> : vector<4x64xf32>
    %10 = tpu.matmul %9, %3, %cst_9 {dimension_numbers = #tpu.dot_dimension_numbers<[1], [0], [0], [1], [0, 0, 1, 1], [], []>} : vector<4x4xf32>, vector<4x64xf32>, vector<4x64xf32> -> vector<4x64xf32>
    %c1 = arith.constant 1 : index
    %c0_10 = arith.constant 0 : index
    %c0_11 = arith.constant 0 : index
    %11 = vector.load %arg4[%c1, %c0_10, %c0_11] : memref<2x4x4xf32, #tpu.memory_space<vmem>>, vector<1x4x4xf32>
    %12 = vector.shape_cast %11 : vector<1x4x4xf32> to vector<4x4xf32>
    %cst_12 = arith.constant dense<0.000000e+00> : vector<4x64xf32>
    %13 = tpu.matmul %12, %7, %cst_12 {dimension_numbers = #tpu.dot_dimension_numbers<[1], [0], [0], [1], [0, 0, 1, 1], [], []>} : vector<4x4xf32>, vector<4x64xf32>, vector<4x64xf32> -> vector<4x64xf32>
    %c0_13 = arith.constant 0 : index
    %c0_14 = arith.constant 0 : index
    %c0_15 = arith.constant 0 : index
    %14 = vector.load %arg5[%c0_13, %c0_14, %c0_15] : memref<2x4x1xf32, #tpu.memory_space<vmem>>, vector<1x4x1xf32>
    %15 = vector.shape_cast %14 : vector<1x4x1xf32> to vector<4x1xf32>
    %16 = vector.broadcast %15 : vector<4x1xf32> to vector<4x64xf32>
    %17 = arith.addf %10, %16 : vector<4x64xf32>
    %c0_16 = arith.constant 0 : index
    %c0_17 = arith.constant 0 : index
    %c0_18 = arith.constant 0 : index
    %c0_19 = arith.constant 0 : index
    %18 = vector.load %arg6[%c0_16, %c0_17, %c0_18, %c0_19] : memref<1x2x4x64xf32, #tpu.memory_space<vmem>>, vector<1x1x4x64xf32>
    %19 = vector.shape_cast %18 : vector<1x1x4x64xf32> to vector<4x64xf32>
    %20 = vector.shape_cast %17 : vector<4x64xf32> to vector<1x1x4x64xf32>
    tpu.vector_store %arg6[%c0_16, %c0_17, %c0_18, %c0_19], %20 {strides = array<i32>} : memref<1x2x4x64xf32, #tpu.memory_space<vmem>>, vector<1x1x4x64xf32>,
    %c1_20 = arith.constant 1 : index
    %c0_21 = arith.constant 0 : index
    %c0_22 = arith.constant 0 : index
    %21 = vector.load %arg5[%c1_20, %c0_21, %c0_22] : memref<2x4x1xf32, #tpu.memory_space<vmem>>, vector<1x4x1xf32>
    %22 = vector.shape_cast %21 : vector<1x4x1xf32> to vector<4x1xf32>
    %23 = vector.broadcast %22 : vector<4x1xf32> to vector<4x64xf32>
    %24 = arith.addf %13, %23 : vector<4x64xf32>
    %c0_23 = arith.constant 0 : index
    %c1_24 = arith.constant 1 : index
    %c0_25 = arith.constant 0 : index
    %c0_26 = arith.constant 0 : index
    %25 = vector.load %arg6[%c0_23, %c1_24, %c0_25, %c0_26] : memref<1x2x4x64xf32, #tpu.memory_space<vmem>>, vector<1x1x4x64xf32>
    %26 = vector.shape_cast %25 : vector<1x1x4x64xf32> to vector<4x64xf32>
    %27 = vector.shape_cast %24 : vector<4x64xf32> to vector<1x1x4x64xf32>
    tpu.vector_store %arg6[%c0_23, %c1_24, %c0_25, %c0_26], %27 {strides = array<i32>} : memref<1x2x4x64xf32, #tpu.memory_space<vmem>>, vector<1x1x4x64xf32>,
    return
  }
  func.func @transform_0(%arg0: i32, %arg1: i32) -> (i32, i32, i32) {
    %c0_i32 = arith.constant 0 : i32
    %c0_i32_0 = arith.constant 0 : i32
    return %arg0, %c0_i32, %arg1 : i32, i32, i32
  }
  func.func @transform_1(%arg0: i32, %arg1: i32) -> (i32, i32, i32) {
    %c0_i32 = arith.constant 0 : i32
    %c0_i32_0 = arith.constant 0 : i32
    return %arg0, %c0_i32, %arg1 : i32, i32, i32
  }
  func.func @transform_2(%arg0: i32, %arg1: i32) -> (i32, i32, i32) {
    %c0_i32 = arith.constant 0 : i32
    %c0_i32_0 = arith.constant 0 : i32
    %c0_i32_1 = arith.constant 0 : i32
    %c0_i32_2 = arith.constant 0 : i32
    return %c0_i32, %c0_i32_0, %c0_i32_1 : i32, i32, i32
  }
  func.func @transform_3(%arg0: i32, %arg1: i32) -> (i32, i32, i32) {
    %c0_i32 = arith.constant 0 : i32
    %c0_i32_0 = arith.constant 0 : i32
    %c0_i32_1 = arith.constant 0 : i32
    %c0_i32_2 = arith.constant 0 : i32
    return %c0_i32, %c0_i32_0, %c0_i32_1 : i32, i32, i32
  }
  func.func @transform_4(%arg0: i32, %arg1: i32) -> (i32, i32, i32, i32) {
    %c0_i32 = arith.constant 0 : i32
    %c0_i32_0 = arith.constant 0 : i32
    %c0_i32_1 = arith.constant 0 : i32
    return %arg0, %c0_i32, %c0_i32_0, %arg1 : i32, i32, i32, i32
  }
}

</mosaic_0001>

<bundles_post_ra>
// kernel: factorized_reduce.1
= control target key start
LH: loop header
LB: loop body
LE: loop exit
PB: predicated region body
PF: predicated region fallthrough
CT: control target
= control target key end

     0   :  { %s640_s15 = smov 0   ;;  %s642_s16 = smov 0   ;;  %s688_s0 = inlined_call_operand.vmem [shape: f32[2,4,64], index: 0, kind: input, shape index: {}]   ;;  %s689_s1 = inlined_call_operand.vmem [shape: f32[2,4,64], index: 1, kind: input, shape index: {}]   ;;  %s690_s2 = inlined_call_operand.vmem [shape: f32[2,4,4], index: 2, kind: input, shape index: {}]   ;;  %s691_s3 = inlined_call_operand.vmem [shape: f32[2,4,1], index: 3, kind: input, shape index: {}]   ;;  %s692_s4 = inlined_call_operand.vmem [shape: f32[2,2,4,64], index: 4, kind: output, shape index: {}]  }
   0x1   :  { %s644_s17 = smov 0  }
   0x2 LB: > { %s26_s18 = sadd.s32 1, %s606_s16  ;;  %p531_p0 = scmp.ge.s32.totalorder %s610_s17, 1  ;;  %s610_s17 = sphi %s644_s17, %s14_s17   ;;  %s606_s16 = sphi %s642_s16, %s694_s16   ;;  %s602_s15 = sphi %s640_s15, %s693_s15  }
   0x3   : > { %p28_p1 = scmp.ge.s32.totalorder %s26_s18, 2  ;;  %p194_p2 = scmp.lt.s32.totalorder %s610_s17, 3 }
   0x5   : > { %s696_s18 = smov (%p28_p1, %s26_s18), 0  ;;  %p195_p3 = pnand %p531_p0, %p194_p2 }
   0x6   : > { %p232_p4 = scmp.lt.s32.totalorder (!%p195_p3), %s602_s15, 1  ;;  %v612_v0 = vmov (!%p195_p3), 0.0   ;;  %v261_v1 = vld [vmem:[%s691_s3] sm:$0xf] (!%p195_p3)  ;;  %vm613_vm0 = vmmov (!%p195_p3), 0   ;;  %v614_v2 = vmov (!%p195_p3), 0  }
   0x7   : > { %198 = sbr.rel (%p195_p3) target bundleno = 237 (0xed), region = 36  ;;  %550 = vmatprep.subr.mxu0 (!%p195_p3), %v612_v0  ;;  %555 = vmatprep.subr.mxu1 (!%p195_p3), %v612_v0  ;;  %vm271_vm1 = vcmask (!%p195_p3), 1043456   ;;  %v539_v3 = vld [vmem:[%s691_s3 + $0x4] sm:$0xf] (!%p195_p3)  ;;  %v258_v6 = vld [vmem:[%s690_s2] sm:$0xf] (!%p195_p3) }
   0x8   : > { %552 = vmatprep.mubr.msk.f32.mxu0 (!%p195_p3), %vm613_vm0, %v612_v0  ;;  %557 = vmatprep.mubr.msk.f32.mxu1 (!%p195_p3), %vm613_vm0, %v612_v0  ;;  %vm267_vm2 = vcmask (!%p195_p3), 31744   ;;  %v536_v9 = vld [vmem:[%s690_s2 + $0x4] sm:$0xf] (!%p195_p3)  ;;  %vm345_vm3 = vcmask (!%p195_p3), 519168  }
   0x9   : > { %587 = vset.pattern.permute.xlu0 (!%p195_p3), %v614_v2 }
   0xa   : > { %264 = vperm.xlu0 (!%p195_p3), %587, %v261_v1  }
   0xe   : > { %s698_s15 = smov (!%p232_p4, %s602_s15), 1  ;;  %351 = vperm.xlu0 %587, %v539_v3  }
   0xf   : > { %s532_s21 = sshll.u32 %s698_s15, 2  ;;  %s545_s8 = sshll.u32 %s698_s15, 3 }
  0x10   : > { %s238_s24 = scalar_lea.vmem %s688_s0, %s532_s21  ;;  %s245_s27 = scalar_lea.vmem %s689_s1, %s532_s21 }
  0x11   : > { %v254_v4 = vld [vmem:[%s238_s24] sm:$0xf]  ;;  %s253_s11 = scalar_lea.vmem %s692_s4, %s545_s8 }
  0x12   : > { %v256_v5 = vld [vmem:[%s245_s27] sm:$0xf]  ;;  %v255_v7 = vmax.f32 %v254_v4, 0.0 }
  0x13   : > { %v257_v8 = vmax.f32 %v256_v5, 0.0 }
  0x14   : > { %551 = vmatpush3.msk.msra.mxu0 %vm271_vm1, %v255_v7 }
  0x15   : > { %556 = vmatpush3.msk.msra.mxu1 %vm271_vm1, %v257_v8  ;;  %553 = vmatmul.mubr.msk.f32.vlgmr.msra.gmra.mrb[0].mxu0 %vm267_vm2, %v258_v6 }
  0x16   : > { %558 = vmatmul.mubr.msk.f32.vlgmr.msra.gmra.mrb[0].mxu1 %vm267_vm2, %v536_v9 }
  0x89   : > { %v265_v10 = vpop.permute.xlu0 %264 }
  0x8d   : > { %v352_v11 = vpop.permute.xlu0 %351 }
  0xe8   : > { %v341_v12 = vpop.f32.mrb[0].mxu0 }
  0xe9   : > { %v426_v13 = vpop.f32.mrb[0].mxu1  ;;  %v342_v14 = vadd.f32 %v341_v12, %v265_v10  ;;  %v554_v16 = vpop.f32.mrb[1].mxu0 }
  0xea   : > { %v427_v15 = vadd.f32 %v426_v13, %v352_v11  ;;  %v559_v17 = vpop.f32.mrb[1].mxu1 }
  0xeb   : > { %346 = vst.msk [vmem:[%s253_s11] sm:$0xf] %vm345_vm3, %v342_v14 }
  0xec   : > { %542 = vst.msk [vmem:[%s253_s11 + $0x4] sm:$0xf] %vm345_vm3, %v427_v15 }
  0xed PF: > { %s14_s17 = sadd.s32 1, %s610_s17   ;;  %s693_s15 = smov %s606_s16 }
  0xee   : > { %p11_p5 = scmp.ge.s32.totalorder %s14_s17, 4   ;;  %s694_s16 = smov %s696_s18 }
  0xf0   :  { %13 = sbr.rel (!%p11_p5) target bundleno = 2 (0x2), region = 72 }

</bundles_post_ra>
